<compile_context>
chip_gen: v5e
topology: v5e:2x2
jax: 0.10.0
libtpu: 0.0.40
codegen_flags: <defaults>
</compile_context>

<pallas_src>
import functools
import math

import jax
import jax.numpy as jnp
from jax.experimental import pallas as pl
from jax.experimental.pallas import tpu as pltpu


def _pe_dropout_kernel(seed_ref, x_ref, pe_ref, o_ref, *,
                       p, apply_dropout, tile_r, row_len):
    # x_ref: (1, tile_r, row_len) VMEM;  pe_ref: (tile_r, row_len) VMEM
    # seed_ref: (1,) int32 in SMEM.
    x = x_ref[...]
    pe = pe_ref[...]                       # already x.dtype (cast in wrapper)
    y = x + pe[None, :, :]                 # broadcast add over the batch dim

    if apply_dropout and p > 0.0:
        r_blk = pl.program_id(0)           # row-tile index
        b_idx = pl.program_id(1)           # batch index (innermost grid axis)

        # Per-element counter inside the tile (2-D iota: TPU needs >= 2D).
        local_r = jax.lax.broadcasted_iota(jnp.int32, (tile_r, row_len), 0)
        local_c = jax.lax.broadcasted_iota(jnp.int32, (tile_r, row_len), 1)
        key = ((local_r << 16) ^ local_c).astype(jnp.uint32)

        # Scalar salt: distinct per (seed, batch, row-tile) -> independent
        # masks per tile / per batch element.  Scalar multiplies only.
        salt = (seed_ref[0].astype(jnp.uint32) * jnp.uint32(0x9E3779B1)
                + b_idx.astype(jnp.uint32) * jnp.uint32(0x85EBCA77)
                + r_blk.astype(jnp.uint32) * jnp.uint32(0xC2B2AE3D))

        # Robert Jenkins' 32-bit integer hash (add/xor/shift only) — avoids
        # vector integer multiplies and the TPU PRNG primitives entirely.
        z = key ^ salt
        z = z + jnp.uint32(0x7ED55D16) + (z << 12)
        z = (z ^ jnp.uint32(0xC761C23C)) ^ (z >> 19)
        z = z + jnp.uint32(0x165667B1) + (z << 5)
        z = (z + jnp.uint32(0xD3A2646C)) ^ (z << 9)
        z = z + jnp.uint32(0xFD7046C5) + (z << 3)
        z = (z ^ jnp.uint32(0xB55A4F09)) ^ (z >> 16)

        # Use 24 random bits; compare in int32 (always-supported signed cmp).
        r24 = (z >> 8).astype(jnp.int32)
        thresh = int(p * (1 << 24))                  # drop probability p
        keep = (r24 >= thresh)[None, :, :]

        scale = jnp.asarray(1.0 / (1.0 - p), dtype=y.dtype)
        y = jnp.where(keep, y * scale, jnp.zeros_like(y))

    o_ref[...] = y.astype(o_ref.dtype)


def make_sinusoidal_pe(max_len, embedding_dim, dtype=jnp.float32):
    """Standard sinusoidal positional-embedding table, shape (max_len, D)."""
    pos = jnp.arange(max_len, dtype=jnp.float32)[:, None]
    div = jnp.exp(
        jnp.arange(0, embedding_dim, 2, dtype=jnp.float32)
        * (-math.log(10000.0) / embedding_dim)
    )
    pe = jnp.zeros((max_len, embedding_dim), jnp.float32)
    pe = pe.at[:, 0::2].set(jnp.sin(pos * div))
    pe = pe.at[:, 1::2].set(jnp.cos(pos * div))
    return pe.astype(dtype)


def positional_encoding(x, pe_table, *, dropout_p=0.1, training=False, seed=0):
    """x: (B, S, D); pe_table: (max_len, D) with max_len >= S."""
    B, S, D = x.shape
    pe = pe_table[:S, :].astype(x.dtype)        # glue: slice + single cast

    # ---- lane-dense 2-D view of each (S, D) slab --------------------------
    # The PE add is purely elementwise in row-major order, so reshaping the
    # per-batch slab does not change values; it only makes stores lane-dense.
    if D % 128 == 0 or (S * D) % 128 != 0:
        n_rows, row_len = S, D
    else:
        row_len = 128
        n_rows = (S * D) // 128
    x_view = x.reshape(B, n_rows, row_len)
    pe_view = pe.reshape(n_rows, row_len)

    # ---- row tiling: largest sublane-aligned tile under ~2 MiB ------------
    itemsize = jnp.dtype(x.dtype).itemsize
    sub = 16 if itemsize < 4 else 8             # bf16 packs 16 sublanes
    max_rows = max(sub, (2 * 1024 * 1024) // max(1, row_len * itemsize))
    if n_rows <= max_rows:
        tile_r = n_rows                         # full extent -> always legal
    else:
        tile_r = max(sub, (max_rows // sub) * sub)

    # Batch is the innermost (fastest) grid axis so the PE tile's block index
    # stays constant across it -> Pallas keeps it resident (no re-DMA).
    grid = (pl.cdiv(n_rows, tile_r), B)

    seed_arr = jnp.asarray([seed], dtype=jnp.int32)

    kernel = functools.partial(
        _pe_dropout_kernel,
        p=float(dropout_p),
        apply_dropout=bool(training),
        tile_r=tile_r,
        row_len=row_len,
    )

    out = pl.pallas_call(
        kernel,
        out_shape=jax.ShapeDtypeStruct((B, n_rows, row_len), x.dtype),
        grid=grid,
        in_specs=[
            pl.BlockSpec(memory_space=pltpu.SMEM),                       # seed
            pl.BlockSpec((1, tile_r, row_len), lambda r, b: (b, r, 0)),  # x
            pl.BlockSpec((tile_r, row_len), lambda r, b: (r, 0)),        # pe
        ],
        out_specs=pl.BlockSpec((1, tile_r, row_len), lambda r, b: (b, r, 0)),
        compiler_params=pltpu.CompilerParams(
            dimension_semantics=("parallel", "arbitrary"),   # v7x megacore
            vmem_limit_bytes=48 * 1024 * 1024,
        ),
    )(seed_arr, x_view, pe_view)

    return out.reshape(B, S, D)


if __name__ == "__main__":
    # Small shapes implied by the forward: (batch, seq_len, embedding_dim).
    B, S, D = 2, 8, 32
    MAX_LEN = 64
    DROPOUT_P = 0.1

    key = jax.random.PRNGKey(0)
    x = jax.random.normal(key, (B, S, D), dtype=jnp.float32)

    pe_table = make_sinusoidal_pe(MAX_LEN, D)
    ref = x + pe_table[:S][None, :, :]

    # Eval mode (dropout = identity): output must equal x + pe.
    y_eval = positional_encoding(x, pe_table, dropout_p=DROPOUT_P, training=False)
    y_eval = jax.block_until_ready(y_eval)
    assert y_eval.shape == (B, S, D)
    assert jnp.allclose(y_eval, ref, atol=1e-6), "eval-mode mismatch"

    # Training mode: in-kernel stateless-hash dropout (deterministic seed).
    y_train = positional_encoding(
        x, pe_table, dropout_p=DROPOUT_P, training=True, seed=0
    )
    y_train = jax.block_until_ready(y_train)
    assert y_train.shape == (B, S, D)
    scaled_ref = ref / (1.0 - DROPOUT_P)
    ok = jnp.logical_or(
        jnp.isclose(y_train, scaled_ref, atol=1e-5), y_train == 0.0
    )
    assert bool(jnp.all(ok)), "training-mode dropout mismatch"
    dropped_frac = float(jnp.mean((y_train == 0.0).astype(jnp.float32)))
    assert 0.0 < dropped_frac < 0.5, f"dropout rate looks wrong: {dropped_frac}"

    print("KERNEL_OK")
</pallas_src>

<mosaic_0001>
module attributes {stable_mosaic.version = 11 : i64} {
  func.func @_pe_dropout_kernel(%arg0: i32, %arg1: i32, %arg2: memref<1xi32, #tpu.memory_space<smem>>, %arg3: memref<1x2x128xf32, #tpu.memory_space<vmem>>, %arg4: memref<2x128xf32, #tpu.memory_space<vmem>>, %arg5: memref<1x2x128xf32, #tpu.memory_space<vmem>>) attributes {dimension_semantics = [#tpu.dimension_semantics<parallel>, #tpu.dimension_semantics<arbitrary>], iteration_bounds = array<i64: 1, 2>, scalar_prefetch = 0 : i64, scratch_operands = 0 : i64, tpu.core_type = #tpu.core_type<tc>, window_params = [{transform_indices = @transform_0, window_bounds = array<i64: 1>}, {transform_indices = @transform_1, window_bounds = array<i64: 1, 2, 128>}, {transform_indices = @transform_2, window_bounds = array<i64: 2, 128>}, {transform_indices = @transform_3, window_bounds = array<i64: 1, 2, 128>}]} {
    %c0 = arith.constant 0 : index
    %c0_0 = arith.constant 0 : index
    %c0_1 = arith.constant 0 : index
    %0 = vector.load %arg3[%c0, %c0_0, %c0_1] : memref<1x2x128xf32, #tpu.memory_space<vmem>>, vector<1x2x128xf32>
    %c0_2 = arith.constant 0 : index
    %c0_3 = arith.constant 0 : index
    %1 = vector.load %arg4[%c0_2, %c0_3] : memref<2x128xf32, #tpu.memory_space<vmem>>, vector<2x128xf32>
    %2 = vector.shape_cast %1 : vector<2x128xf32> to vector<1x2x128xf32>
    %3 = arith.addf %0, %2 : vector<1x2x128xf32>
    %c0_4 = arith.constant 0 : index
    %c0_5 = arith.constant 0 : index
    %c0_6 = arith.constant 0 : index
    %4 = vector.load %arg5[%c0_4, %c0_5, %c0_6] : memref<1x2x128xf32, #tpu.memory_space<vmem>>, vector<1x2x128xf32>
    tpu.vector_store %arg5[%c0_4, %c0_5, %c0_6], %3 {strides = array<i32>} : memref<1x2x128xf32, #tpu.memory_space<vmem>>, vector<1x2x128xf32>,
    return
  }
  func.func @transform_0(%arg0: i32, %arg1: i32) -> i32 {
    %c0_i32 = arith.constant 0 : i32
    %c0_i32_0 = arith.constant 0 : i32
    return %c0_i32 : i32
  }
  func.func @transform_1(%arg0: i32, %arg1: i32) -> (i32, i32, i32) {
    %c0_i32 = arith.constant 0 : i32
    %c0_i32_0 = arith.constant 0 : i32
    return %arg1, %arg0, %c0_i32 : i32, i32, i32
  }
  func.func @transform_2(%arg0: i32, %arg1: i32) -> (i32, i32) {
    %c0_i32 = arith.constant 0 : i32
    %c0_i32_0 = arith.constant 0 : i32
    return %arg0, %c0_i32 : i32, i32
  }
  func.func @transform_3(%arg0: i32, %arg1: i32) -> (i32, i32, i32) {
    %c0_i32 = arith.constant 0 : i32
    %c0_i32_0 = arith.constant 0 : i32
    return %arg1, %arg0, %c0_i32 : i32, i32, i32
  }
}

</mosaic_0001>

<bundles_post_ra>
// kernel: tpu_custom_call.1
= control target key start
LH: loop header
LB: loop body
LE: loop exit
PB: predicated region body
PF: predicated region fallthrough
CT: control target
= control target key end

     0   :  { %9 = vsyncpa [#allocation4], 0  ;;  %s672_s0 = inlined_call_operand.<no memory space> [shape: s32[1], index: 0, kind: input, shape index: {}]   ;;  %s673_s1 = inlined_call_operand.hbm [shape: f32[2,2,128], index: 1, kind: input, shape index: {}]   ;;  %s674_s2 = inlined_call_operand.vmem [shape: f32[2,128], index: 2, kind: input, shape index: {}]   ;;  %s675_s3 = inlined_call_operand.hbm [shape: f32[2,2,128], index: 3, kind: output, shape index: {}]  }
   0x1   :  { %11 = vsyncpa [#allocation4 + $0x1], 0 }
   0x2   :  { %12 = vsyncpa [#allocation5], 0 }
   0x3   :  { %14 = vsyncpa [#allocation5 + $0x1], 0  ;;  %s549_s12 = smov 0   ;;  %s551_s13 = smov 0  }
   0x4   :  { %s553_s14 = smov 0   ;;  %s555_s0 = smov 0  }
   0x5   :  { %s557_s15 = smov 0   ;;  %s559_s16 = smov 0  }
   0x6 LB: > { %s339_s17 = sadd.s32 4294967295, %s527_s16   ;;  %s340_s18 = sadd.s32 4294967294, %s527_s16   ;;  %s527_s16 = sphi %s559_s16, %s20_s16   ;;  %s523_s15 = sphi %s557_s15, %s684_s15   ;;  %s519_s0 = sphi %s555_s0, %s683_s0   ;;  %s515_s14 = sphi %s553_s14, %s682_s14   ;;  %s511_s13 = sphi %s551_s13, %s681_s13   ;;  %s507_s12 = sphi %s549_s12, %s680_s12  }
   0x7   : > { %s29_s19 = sadd.s32 1, %s523_s15  ;;  %s62_s20 = sadd.s32 1, %s515_s14 }
   0x8   : > { %p30_p0 = scmp.ge.s32.totalorder %s29_s19, 2  ;;  %p69_p1 = scmp.ne.s32.totalorder %s515_s14, %s511_s13 }
   0x9   : > { %p70_p2 = scmp.eq.s32.totalorder %s527_s16, 0  ;;  %p75_p3 = scmp.ne.s32.totalorder %s511_s13, %s507_s12 }
   0xa   : > { %s686_s19 = smov (%p30_p0, %s29_s19), 0  ;;  %p76_p5 = scmp.eq.s32.totalorder %s339_s17, 0 }
   0xb   : > { %p590_p4 = por %p70_p2, %p69_p1  ;;  %s57_s22 = ssub.s32 %s523_s15, %s686_s19 }
   0xc   : > { %p127_p6 = scmp.eq.s32.totalorder %s339_s17, 1  ;;  %p60_p7 = scmp.eq.s32.totalorder %s57_s22, 0 }
   0xd   : > { %p596_p8 = por %p76_p5, %p75_p3  ;;  %p133_p10 = scmp.eq.s32.totalorder %s340_s18, 1 }
   0xe   : > { %p600_p9 = por %p127_p6, %p69_p1  ;;  %p343_p12 = scmp.ge.s32.totalorder %s527_s16, 2 }
   0xf   : > { %s605_s25 = scalar_select %p60_p7, %s515_s14, %s62_s20  }
  0x10   : > { %p607_p11 = por %p133_p10, %p75_p3  ;;  %p365_p13 = scmp.lt.s32.totalorder %s527_s16, 2 }
  0x11   : > { %s163_s27 = sand.u32 1, %s515_s14   ;;  %s345_s29 = sshll.u32 %s523_s15, 1 }
  0x12   : > { %s344_s28 = sshll.u32 %s163_s27, 1  ;;  %s172_s5 = scalar_lea.hbm %s673_s1, %s345_s29 }
  0x13   : > { %s167_s6 = scalar_lea.vmem [#allocation3], %s344_s28  ;;  %s174_s8 = sshll.u32 %s172_s5, 4  ;;  %s175_s8 = int_to_ptr.hbm [resolvable:$true] %s174_s8 }
  0x14   : > { %s176_s7 = sshll.u32 %s167_s6, 4  ;;  %p358_p0 = pnand %p365_p13, %p590_p4  ;;  %s177_s7 = int_to_ptr.vmem [resolvable:$true] %s176_s7 }
  0x15   : > { %p346_p1 = scmp.ge.s32.totalorder %s527_s16, 1  ;;  %p181_p2 = scmp.lt.s32.totalorder %s527_s16, 3 }
  0x16   : > { %s164_s9 = scalar_lea.sflag [#allocation4], %s163_s27 }
  0x17   : > { %360 = dma.hbm_to_vmem [thread:$0]  (!%p358_p0), %s175_s8, 32, %s177_s7, %s164_s9  }
  0x18   : > { %p182_p3 = pnand %p346_p1, %p181_p2 }
  0x19   : > { %s623_s10 = sand.u32 (!%p182_p3), 1, %s511_s13  }
  0x1a   : > { %185 = sbr.rel (%p182_p3) target bundleno = 47 (0x2f), region = 32  ;;  %s347_s11 = sshll.u32 (!%p182_p3), %s623_s10, 1 }
  0x1b   : > { %s188_s17 = scalar_lea.sflag (!%p182_p3), [#allocation4], %s623_s10  ;;  %s191_s18 = scalar_lea.vmem (!%p182_p3), [#allocation3], %s347_s11 }
  0x1f   : > { %498 = dma.done.wait (%p596_p8), %s188_s17, 32  }
  0x20   : > { %500 = vsyncadd (%p596_p8), %s188_s17, 4294967264  ;;  %s350_s20 = sshll.u32 %s519_s0, 1  ;;  %s218_s28 = scalar_lea.vmem [#allocation6], %s347_s11  ;;  %v223_v0 = vld [vmem:[%s191_s18] sm:$0x3] }
  0x21   : > { %s239_s27 = scalar_lea.hbm %s675_s3, %s350_s20  ;;  %s241_s29 = sshll.u32 %s218_s28, 4  ;;  %v224_v1 = vld [vmem:[%s674_s2] sm:$0x3]  ;;  %s242_s29 = int_to_ptr.vmem [resolvable:$true] %s241_s29 }
  0x22   : > { %s243_s30 = sshll.u32 %s239_s27, 4  ;;  %v225_v2 = vadd.f32 %v224_v1, %v223_v0  ;;  %s228_s23 = scalar_lea.sflag [#allocation5], %s623_s10  ;;  %s244_s30 = int_to_ptr.hbm [resolvable:$true] %s243_s30 }
  0x23   : > { %s459_s6 = sshra.s32 %s244_s30, 4  ;;  %s465_s9 = scalar_lea.hbm %s675_s3, 4  ;;  %s460_s6 = int_to_ptr.hbm [resolvable:$true] %s459_s6 }
  0x24   : > { %226 = vst [vmem:[%s218_s28] sm:$0x3] %v225_v2  ;;  %s461_s0 = scalar_lea.hbm %s460_s6, 2  ;;  %p466_p7 = scmp.lt.s32.totalorder %s460_s6, %s675_s3 }
  0x25   : > { %p462_p4 = scmp.ne.s32.totalorder %s460_s6, %s461_s0  ;;  %p467_p8 = scmp.lt.s32.totalorder %s465_s9, %s461_s0 }
  0x27   : > { %p463_p5 = pnand %p462_p4, %p600_p9  ;;  %p468_p10 = por %p467_p8, %p466_p7 }
  0x29   : > { %p464_p6 = pneg %p463_p5 }
  0x2b   : > { %p469_p13 = pnand %p468_p10, %p464_p6 }
  0x2d   : > { %472 = shalt.err (!%p469_p13)
}
  0x2e   : > { %355 = dma.vmem_to_hbm [thread:$0]  (%p600_p9), %s242_s29, 32, %s244_s30, %s228_s23  }
  0x2f PF: > { %s255_s10 = sand.u32 1, %s507_s12   ;;  %p362_p0 = pnand %p343_p12, %p607_p11 }
  0x30   : > { %s256_s18 = scalar_lea.sflag [#allocation5], %s255_s10 }
  0x31   : > { %p363_p1 = pneg %p362_p0 }
  0x33   : > { %502 = dma.done.wait (%p363_p1), %s256_s18, 32  }
  0x34   : > { %504 = vsyncadd (%p363_p1), %s256_s18, 4294967264  ;;  %s20_s16 = sadd.s32 1, %s527_s16   ;;  %s680_s12 = smov %s511_s13 }
  0x35   : > { %p17_p2 = scmp.ge.s32.totalorder %s20_s16, 4   ;;  %s681_s13 = smov %s515_s14 }
  0x36   : > { %s682_s14 = smov %s605_s25  ;;  %s683_s0 = smov %s523_s15 }
  0x37   : > { %s684_s15 = smov %s686_s19  ;;  %19 = sbr.rel (!%p17_p2) target bundleno = 6 (0x6), region = 80 }
  0x3c   :  { %262 = vsyncpa [#allocation4], 1 }
  0x3d   :  { %264 = vsyncpa [#allocation4 + $0x1], 1 }
  0x3e   :  { %265 = vsyncpa [#allocation5], 1 }
  0x3f   :  { %267 = vsyncpa [#allocation5 + $0x1], 1 }

</bundles_post_ra>
